<compile_context>
chip_gen: v7x
topology: tpu7x:2x2x1
jax: 0.10.0
libtpu: 0.0.40
codegen_flags: <defaults>
</compile_context>

<pallas_src>
import functools

import jax
import jax.numpy as jnp
from jax.experimental import pallas as pl
from jax.experimental.pallas import tpu as pltpu

LN_EPS = 1e-5  # torch.nn.LayerNorm default eps


def _round_up(x, m):
    return (x + m - 1) // m * m


def _vmem_budget_bytes():
    """~80% of the per-core VMEM capacity (102 MiB on v5e/v6e, 51 MiB on v7x);
    conservative v7x-safe fallback if the query is unavailable."""
    cap = 64 * 1024 * 1024
    try:
        cap = int(pltpu.get_tpu_info().vmem_capacity_bytes)
    except Exception:
        pass
    return int(cap * 0.80)


def _choose_tiles(m, k_pad, e_pad, in_itemsize, out_itemsize, budget_bytes,
                  row_align):
    """Pick the row tile TM, padded row count M_pad and grid size G.

    VMEM model per grid step:
      resident : projection weight (compute dtype) + packed f32 params,
                 single-buffered (constant index_map).
      streamed : double-buffered input rows (compute dtype) AND output rows
                 (output dtype) -- counted with their own itemsizes.
      interm   : f32 in-kernel temporaries (acc / centered / out), counted
                 generously (4 copies) so vreg spill / internal scratch never
                 pushes past the limit.
    """
    resident = k_pad * e_pad * in_itemsize + 8 * e_pad * 4
    tm = 2048
    while tm > row_align:
        streamed = 2 * tm * k_pad * in_itemsize + 2 * tm * e_pad * out_itemsize
        interm = 4 * tm * e_pad * 4
        if resident + streamed + interm <= budget_bytes:
            break
        tm //= 2
    tm = max(tm, row_align)

    # Rebalance into G nearly-equal steps: keeps M padding < row_align*G (tiny,
    # fuses into the patchify) and guarantees >= 2 steps whenever the problem
    # has enough rows, so v7x's two TensorCores both get work on the
    # "parallel" row axis (the extra ~0.35us step is noise on v5e/v6e).
    g = max(1, -(-m // tm))          # cdiv
    if g == 1 and m >= 2 * row_align:
        g = 2
    tm = _round_up(-(-m // g), row_align)
    m_pad = g * tm
    return tm, m_pad, g


def _patch_embed_kernel(x_ref, w_ref, p_ref, o_ref, *, e_true):
    # x_ref: (TM, K_pad)    streamed patch rows (compute dtype)
    # w_ref: (K_pad, E_pad) resident projection weight (compute dtype)
    # p_ref: (8, E_pad)     resident f32 params: row0=bias, row1=gamma, row2=beta
    # o_ref: (TM, E_pad)    output tile (x dtype)
    acc = jnp.dot(x_ref[...], w_ref[...], preferred_element_type=jnp.float32)
    bias = p_ref[0:1, :]
    gamma = p_ref[1:2, :]
    beta = p_ref[2:3, :]
    acc = acc + bias

    e_pad = acc.shape[-1]
    inv_e = 1.0 / float(e_true)
    # Padded columns of acc are exact zeros (zero-padded W columns and bias),
    # so the padded-width sums reduce to the true-width sums up to a closed
    # form correction -- no iota/mask needed.
    mean = jnp.sum(acc, axis=-1, keepdims=True) * inv_e
    centered = acc - mean
    ssq = jnp.sum(centered * centered, axis=-1, keepdims=True)
    if e_pad != e_true:
        ssq = ssq - float(e_pad - e_true) * (mean * mean)
    var = ssq * inv_e

    out = centered * jax.lax.rsqrt(var + LN_EPS) * gamma + beta
    # gamma/beta padding is zero => padded output columns are exactly zero.
    o_ref[...] = out.astype(o_ref.dtype)


def patch_embedding(x, conv_w, conv_b, ln_gamma, ln_beta, patch_size,
                    *, compute_dtype=None):
    """Forward pass of PatchEmbedding.

    x:       (B, C, H, W)      NCHW, like the PyTorch module
    conv_w:  (E, C, ps, ps)    nn.Conv2d weight layout
    conv_b:  (E,)
    ln_gamma, ln_beta: (E,)
    compute_dtype: matmul-input dtype. Defaults to bfloat16 for f32 inputs
                   (halves streamed HBM bytes, native MXU dtype); accumulation
                   and LayerNorm are always f32.
    returns: (B, Np, E) with Np = (H//ps)*(W//ps), dtype = x.dtype
    """
    B, C, H, W = x.shape
    E = conv_w.shape[0]
    ps = patch_size
    assert H % ps == 0 and W % ps == 0
    Hp, Wp = H // ps, W // ps
    Np = Hp * Wp
    K = C * ps * ps
    M = B * Np

    out_dtype = jnp.dtype(x.dtype)
    if compute_dtype is None:
        compute_dtype = jnp.bfloat16 if out_dtype == jnp.float32 else out_dtype
    cdt = jnp.dtype(compute_dtype)

    # ---- glue: patchify in (c, ph, pw) order to match Conv2d contraction ----
    # Single XLA fusion; emitted directly in the matmul-input dtype.
    patches = x.reshape(B, C, Hp, ps, Wp, ps)
    patches = patches.transpose(0, 2, 4, 1, 3, 5)        # (B, Hp, Wp, C, ps, ps)
    patches = patches.reshape(M, K).astype(cdt)          # (M, K)
    w2d = conv_w.reshape(E, K).T.astype(cdt)              # (K, E)

    # ---- lane alignment: pad K and E to multiples of 128 ----
    K_pad = _round_up(K, 128)
    E_pad = _round_up(E, 128)

    # Sublane packing of the streamed/compute dtype (f32:8, bf16:16, 8-bit:32).
    row_align = 8 if cdt.itemsize >= 4 else (16 if cdt.itemsize == 2 else 32)

    budget = _vmem_budget_bytes()
    TM, M_pad, grid_m = _choose_tiles(M, K_pad, E_pad, cdt.itemsize,
                                      out_dtype.itemsize, budget, row_align)

    if (M_pad, K_pad) != (M, K):
        # M padding is < one row tile (G*row_align-ish) by construction; the
        # pad fuses into the patchify transpose fusion above.
        patches = jnp.pad(patches, ((0, M_pad - M), (0, K_pad - K)))
    if (K_pad, E_pad) != (K, E):
        w2d = jnp.pad(w2d, ((0, K_pad - K), (0, E_pad - E)))

    # Pack conv bias / LN gamma / LN beta (kept in f32) into one (8, E_pad)
    # resident operand: one DMA descriptor, one padded tile instead of three.
    params = jnp.zeros((8, E_pad), jnp.float32)
    params = params.at[0, :E].set(conv_b.astype(jnp.float32))
    params = params.at[1, :E].set(ln_gamma.astype(jnp.float32))
    params = params.at[2, :E].set(ln_beta.astype(jnp.float32))

    cost = pl.CostEstimate(
        flops=2 * M_pad * K_pad * E_pad,
        transcendentals=M_pad,  # one rsqrt per row
        bytes_accessed=(M_pad * K_pad + K_pad * E_pad) * cdt.itemsize
        + M_pad * E_pad * out_dtype.itemsize
        + 8 * E_pad * 4,
    )

    kernel = functools.partial(_patch_embed_kernel, e_true=E)

    def _launch(single_buffer_resident):
        # Resident operands have constant index_maps -> a second pipeline
        # buffer is dead VMEM; request single buffering when supported.
        pm = ({"pipeline_mode": pl.Buffered(1)}
              if single_buffer_resident else {})
        return pl.pallas_call(
            kernel,
            out_shape=jax.ShapeDtypeStruct((M_pad, E_pad), out_dtype),
            grid_spec=pltpu.PrefetchScalarGridSpec(
                num_scalar_prefetch=0,
                grid=(grid_m,),
                in_specs=[
                    pl.BlockSpec((TM, K_pad), lambda i: (i, 0)),          # streamed rows
                    pl.BlockSpec((K_pad, E_pad), lambda i: (0, 0), **pm),  # resident weight
                    pl.BlockSpec((8, E_pad), lambda i: (0, 0), **pm),      # resident params
                ],
                out_specs=pl.BlockSpec((TM, E_pad), lambda i: (i, 0)),
            ),
            compiler_params=pltpu.CompilerParams(
                dimension_semantics=("parallel",),  # row blocks independent -> megacore
                vmem_limit_bytes=budget,
            ),
            cost_estimate=cost,
        )(patches, w2d, params)

    try:
        out = _launch(True)
    except Exception:
        # Fallback for JAX versions without BlockSpec pipeline_mode / Buffered(1).
        out = _launch(False)

    return out[:M, :E].reshape(B, Np, E)


def _reference(x, conv_w, conv_b, ln_gamma, ln_beta, patch_size):
    # Independent reference using lax.conv (NCHW / OIHW), matching PyTorch.
    y = jax.lax.conv_general_dilated(
        x.astype(jnp.float32), conv_w.astype(jnp.float32),
        window_strides=(patch_size, patch_size), padding="VALID",
        dimension_numbers=("NCHW", "OIHW", "NCHW"))
    y = y + conv_b.reshape(1, -1, 1, 1)
    B, E, Hp, Wp = y.shape
    y = y.reshape(B, E, Hp * Wp).transpose(0, 2, 1)      # (B, Np, E)
    mean = jnp.mean(y, axis=-1, keepdims=True)
    var = jnp.mean((y - mean) ** 2, axis=-1, keepdims=True)
    y = (y - mean) / jnp.sqrt(var + LN_EPS)
    return y * ln_gamma + ln_beta


if __name__ == "__main__":
    # Small shapes consistent with the module.
    img_size = 16
    patch_size = 4
    in_channels = 4
    embedding_dim = 32
    batch = 2

    key = jax.random.PRNGKey(0)
    kx, kw, kb = jax.random.split(key, 3)

    x = jax.random.normal(kx, (batch, in_channels, img_size, img_size),
                          dtype=jnp.float32)
    conv_w = jax.random.normal(
        kw, (embedding_dim, in_channels, patch_size, patch_size),
        dtype=jnp.float32) * 0.05
    conv_b = jax.random.normal(kb, (embedding_dim,), dtype=jnp.float32) * 0.05
    ln_gamma = jnp.ones((embedding_dim,), dtype=jnp.float32)   # nn.LayerNorm default
    ln_beta = jnp.zeros((embedding_dim,), dtype=jnp.float32)

    ref = _reference(x, conv_w, conv_b, ln_gamma, ln_beta, patch_size)
    expected_shape = (batch, (img_size // patch_size) ** 2, embedding_dim)

    # Exact path: f32 streaming, tight tolerance.
    out_f32 = patch_embedding(x, conv_w, conv_b, ln_gamma, ln_beta, patch_size,
                              compute_dtype=jnp.float32)
    out_f32 = jax.block_until_ready(out_f32)
    assert out_f32.shape == expected_shape
    assert jnp.allclose(out_f32, ref, atol=1e-4, rtol=1e-4), "f32 mismatch vs reference"

    # Default path: bf16 streaming, f32 accumulation + LayerNorm.
    out_def = patch_embedding(x, conv_w, conv_b, ln_gamma, ln_beta, patch_size)
    out_def = jax.block_until_ready(out_def)
    assert out_def.shape == expected_shape
    assert out_def.dtype == x.dtype
    assert jnp.allclose(out_def, ref, atol=5e-2, rtol=5e-2), "bf16 mismatch vs reference"

    print("KERNEL_OK")
</pallas_src>

<mosaic_0001>
module attributes {stable_mosaic.version = 11 : i64} {
  func.func @_patch_embed_kernel(%arg0: i32, %arg1: memref<16x128xf32, #tpu.memory_space<vmem>>, %arg2: memref<128x128xf32, #tpu.memory_space<vmem>>, %arg3: memref<8x128xf32, #tpu.memory_space<vmem>>, %arg4: memref<16x128xf32, #tpu.memory_space<vmem>>) attributes {dimension_semantics = [#tpu.dimension_semantics<parallel>], iteration_bounds = array<i64: 2>, scalar_prefetch = 0 : i64, scratch_operands = 0 : i64, tpu.core_type = #tpu.core_type<tc>, window_params = [{transform_indices = @transform_0, window_bounds = array<i64: 16, 128>}, {pipeline_mode = #tpu.pipeline_mode<synchronous>, transform_indices = @transform_1, window_bounds = array<i64: 128, 128>}, {pipeline_mode = #tpu.pipeline_mode<synchronous>, transform_indices = @transform_2, window_bounds = array<i64: 8, 128>}, {transform_indices = @transform_3, window_bounds = array<i64: 16, 128>}]} {
    %c0 = arith.constant 0 : index
    %c0_0 = arith.constant 0 : index
    %0 = vector.load %arg1[%c0, %c0_0] : memref<16x128xf32, #tpu.memory_space<vmem>>, vector<16x128xf32>
    %c0_1 = arith.constant 0 : index
    %c0_2 = arith.constant 0 : index
    %1 = vector.load %arg2[%c0_1, %c0_2] : memref<128x128xf32, #tpu.memory_space<vmem>>, vector<128x128xf32>
    %cst = arith.constant dense<0.000000e+00> : vector<16x128xf32>
    %2 = tpu.matmul %0, %1, %cst {dimension_numbers = #tpu.dot_dimension_numbers<[1], [0], [0], [1], [0, 0, 1, 1], [], []>} : vector<16x128xf32>, vector<128x128xf32>, vector<16x128xf32> -> vector<16x128xf32>
    %c0_3 = arith.constant 0 : index
    %c0_4 = arith.constant 0 : index
    %3 = vector.load %arg3[%c0_3, %c0_4] : memref<8x128xf32, #tpu.memory_space<vmem>>, vector<1x128xf32>
    %c1 = arith.constant 1 : index
    %c0_5 = arith.constant 0 : index
    %4 = vector.load %arg3[%c1, %c0_5] : memref<8x128xf32, #tpu.memory_space<vmem>>, vector<1x128xf32>
    %c2 = arith.constant 2 : index
    %c0_6 = arith.constant 0 : index
    %5 = vector.load %arg3[%c2, %c0_6] : memref<8x128xf32, #tpu.memory_space<vmem>>, vector<1x128xf32>
    %6 = vector.broadcast %3 : vector<1x128xf32> to vector<16x128xf32>
    %7 = arith.addf %2, %6 : vector<16x128xf32>
    %cst_7 = arith.constant dense<0.000000e+00> : vector<16xf32>
    %8 = vector.multi_reduction <add>, %7, %cst_7 [1] : vector<16x128xf32> to vector<16xf32>
    %9 = vector.shape_cast %8 : vector<16xf32> to vector<16x1xf32>
    %cst_8 = arith.constant 3.125000e-02 : f32
    %10 = vector.broadcast %cst_8 : f32 to vector<16x1xf32>
    %11 = arith.mulf %9, %10 : vector<16x1xf32>
    %12 = vector.broadcast %11 : vector<16x1xf32> to vector<16x128xf32>
    %13 = arith.subf %7, %12 : vector<16x128xf32>
    %14 = arith.mulf %13, %13 : vector<16x128xf32>
    %cst_9 = arith.constant dense<0.000000e+00> : vector<16xf32>
    %15 = vector.multi_reduction <add>, %14, %cst_9 [1] : vector<16x128xf32> to vector<16xf32>
    %16 = vector.shape_cast %15 : vector<16xf32> to vector<16x1xf32>
    %17 = arith.mulf %11, %11 : vector<16x1xf32>
    %cst_10 = arith.constant 9.600000e+01 : f32
    %18 = vector.broadcast %cst_10 : f32 to vector<16x1xf32>
    %19 = arith.mulf %18, %17 : vector<16x1xf32>
    %20 = arith.subf %16, %19 : vector<16x1xf32>
    %cst_11 = arith.constant 3.125000e-02 : f32
    %21 = vector.broadcast %cst_11 : f32 to vector<16x1xf32>
    %22 = arith.mulf %20, %21 : vector<16x1xf32>
    %cst_12 = arith.constant 9.99999974E-6 : f32
    %23 = vector.broadcast %cst_12 : f32 to vector<16x1xf32>
    %24 = arith.addf %22, %23 : vector<16x1xf32>
    %25 = math.rsqrt %24 : vector<16x1xf32>
    %26 = vector.broadcast %25 : vector<16x1xf32> to vector<16x128xf32>
    %27 = arith.mulf %13, %26 : vector<16x128xf32>
    %28 = vector.broadcast %4 : vector<1x128xf32> to vector<16x128xf32>
    %29 = arith.mulf %27, %28 : vector<16x128xf32>
    %30 = vector.broadcast %5 : vector<1x128xf32> to vector<16x128xf32>
    %31 = arith.addf %29, %30 : vector<16x128xf32>
    %c0_13 = arith.constant 0 : index
    %c0_14 = arith.constant 0 : index
    %32 = vector.load %arg4[%c0_13, %c0_14] : memref<16x128xf32, #tpu.memory_space<vmem>>, vector<16x128xf32>
    tpu.vector_store %arg4[%c0_13, %c0_14], %31 {strides = array<i32>} : memref<16x128xf32, #tpu.memory_space<vmem>>, vector<16x128xf32>,
    return
  }
  func.func @transform_0(%arg0: i32) -> (i32, i32) {
    %c0_i32 = arith.constant 0 : i32
    %c0_i32_0 = arith.constant 0 : i32
    return %arg0, %c0_i32 : i32, i32
  }
  func.func @transform_1(%arg0: i32) -> (i32, i32) {
    %c0_i32 = arith.constant 0 : i32
    %c0_i32_0 = arith.constant 0 : i32
    %c0_i32_1 = arith.constant 0 : i32
    return %c0_i32, %c0_i32_0 : i32, i32
  }
  func.func @transform_2(%arg0: i32) -> (i32, i32) {
    %c0_i32 = arith.constant 0 : i32
    %c0_i32_0 = arith.constant 0 : i32
    %c0_i32_1 = arith.constant 0 : i32
    return %c0_i32, %c0_i32_0 : i32, i32
  }
  func.func @transform_3(%arg0: i32) -> (i32, i32) {
    %c0_i32 = arith.constant 0 : i32
    %c0_i32_0 = arith.constant 0 : i32
    return %arg0, %c0_i32 : i32, i32
  }
}

module attributes {stable_mosaic.version = 11 : i64} {
  func.func @_patch_embed_kernel(%arg0: i32, %arg1: memref<16x128xf32, #tpu.memory_space<vmem>>, %arg2: memref<128x128xf32, #tpu.memory_space<vmem>>, %arg3: memref<8x128xf32, #tpu.memory_space<vmem>>, %arg4: memref<16x128xf32, #tpu.memory_space<vmem>>) attributes {dimension_semantics = [#tpu.dimension_semantics<parallel>], iteration_bounds = array<i64: 2>, scalar_prefetch = 0 : i64, scratch_operands = 0 : i64, tpu.core_type = #tpu.core_type<tc>, window_params = [{transform_indices = @transform_0, window_bounds = array<i64: 16, 128>}, {pipeline_mode = #tpu.pipeline_mode<synchronous>, transform_indices = @transform_1, window_bounds = array<i64: 128, 128>}, {pipeline_mode = #tpu.pipeline_mode<synchronous>, transform_indices = @transform_2, window_bounds = array<i64: 8, 128>}, {transform_indices = @transform_3, window_bounds = array<i64: 16, 128>}]} {
    %c0 = arith.constant 0 : index
    %c0_0 = arith.constant 0 : index
    %0 = vector.load %arg1[%c0, %c0_0] : memref<16x128xf32, #tpu.memory_space<vmem>>, vector<16x128xf32>
    %c0_1 = arith.constant 0 : index
    %c0_2 = arith.constant 0 : index
    %1 = vector.load %arg2[%c0_1, %c0_2] : memref<128x128xf32, #tpu.memory_space<vmem>>, vector<128x128xf32>
    %cst = arith.constant dense<0.000000e+00> : vector<16x128xf32>
    %2 = tpu.matmul %0, %1, %cst {dimension_numbers = #tpu.dot_dimension_numbers<[1], [0], [0], [1], [0, 0, 1, 1], [], []>} : vector<16x128xf32>, vector<128x128xf32>, vector<16x128xf32> -> vector<16x128xf32>
    %c0_3 = arith.constant 0 : index
    %c0_4 = arith.constant 0 : index
    %3 = vector.load %arg3[%c0_3, %c0_4] : memref<8x128xf32, #tpu.memory_space<vmem>>, vector<1x128xf32>
    %c1 = arith.constant 1 : index
    %c0_5 = arith.constant 0 : index
    %4 = vector.load %arg3[%c1, %c0_5] : memref<8x128xf32, #tpu.memory_space<vmem>>, vector<1x128xf32>
    %c2 = arith.constant 2 : index
    %c0_6 = arith.constant 0 : index
    %5 = vector.load %arg3[%c2, %c0_6] : memref<8x128xf32, #tpu.memory_space<vmem>>, vector<1x128xf32>
    %6 = vector.broadcast %3 : vector<1x128xf32> to vector<16x128xf32>
    %7 = arith.addf %2, %6 : vector<16x128xf32>
    %cst_7 = arith.constant dense<0.000000e+00> : vector<16xf32>
    %8 = vector.multi_reduction <add>, %7, %cst_7 [1] : vector<16x128xf32> to vector<16xf32>
    %9 = vector.shape_cast %8 : vector<16xf32> to vector<16x1xf32>
    %cst_8 = arith.constant 3.125000e-02 : f32
    %10 = vector.broadcast %cst_8 : f32 to vector<16x1xf32>
    %11 = arith.mulf %9, %10 : vector<16x1xf32>
    %12 = vector.broadcast %11 : vector<16x1xf32> to vector<16x128xf32>
    %13 = arith.subf %7, %12 : vector<16x128xf32>
    %14 = arith.mulf %13, %13 : vector<16x128xf32>
    %cst_9 = arith.constant dense<0.000000e+00> : vector<16xf32>
    %15 = vector.multi_reduction <add>, %14, %cst_9 [1] : vector<16x128xf32> to vector<16xf32>
    %16 = vector.shape_cast %15 : vector<16xf32> to vector<16x1xf32>
    %17 = arith.mulf %11, %11 : vector<16x1xf32>
    %cst_10 = arith.constant 9.600000e+01 : f32
    %18 = vector.broadcast %cst_10 : f32 to vector<16x1xf32>
    %19 = arith.mulf %18, %17 : vector<16x1xf32>
    %20 = arith.subf %16, %19 : vector<16x1xf32>
    %cst_11 = arith.constant 3.125000e-02 : f32
    %21 = vector.broadcast %cst_11 : f32 to vector<16x1xf32>
    %22 = arith.mulf %20, %21 : vector<16x1xf32>
    %cst_12 = arith.constant 9.99999974E-6 : f32
    %23 = vector.broadcast %cst_12 : f32 to vector<16x1xf32>
    %24 = arith.addf %22, %23 : vector<16x1xf32>
    %25 = math.rsqrt %24 : vector<16x1xf32>
    %26 = vector.broadcast %25 : vector<16x1xf32> to vector<16x128xf32>
    %27 = arith.mulf %13, %26 : vector<16x128xf32>
    %28 = vector.broadcast %4 : vector<1x128xf32> to vector<16x128xf32>
    %29 = arith.mulf %27, %28 : vector<16x128xf32>
    %30 = vector.broadcast %5 : vector<1x128xf32> to vector<16x128xf32>
    %31 = arith.addf %29, %30 : vector<16x128xf32>
    %c0_13 = arith.constant 0 : index
    %c0_14 = arith.constant 0 : index
    %32 = vector.load %arg4[%c0_13, %c0_14] : memref<16x128xf32, #tpu.memory_space<vmem>>, vector<16x128xf32>
    tpu.vector_store %arg4[%c0_13, %c0_14], %31 {strides = array<i32>} : memref<16x128xf32, #tpu.memory_space<vmem>>, vector<16x128xf32>,
    return
  }
  func.func @transform_0(%arg0: i32) -> (i32, i32) {
    %c0_i32 = arith.constant 0 : i32
    %c0_i32_0 = arith.constant 0 : i32
    return %arg0, %c0_i32 : i32, i32
  }
  func.func @transform_1(%arg0: i32) -> (i32, i32) {
    %c0_i32 = arith.constant 0 : i32
    %c0_i32_0 = arith.constant 0 : i32
    %c0_i32_1 = arith.constant 0 : i32
    return %c0_i32, %c0_i32_0 : i32, i32
  }
  func.func @transform_2(%arg0: i32) -> (i32, i32) {
    %c0_i32 = arith.constant 0 : i32
    %c0_i32_0 = arith.constant 0 : i32
    %c0_i32_1 = arith.constant 0 : i32
    return %c0_i32, %c0_i32_0 : i32, i32
  }
  func.func @transform_3(%arg0: i32) -> (i32, i32) {
    %c0_i32 = arith.constant 0 : i32
    %c0_i32_0 = arith.constant 0 : i32
    return %arg0, %c0_i32 : i32, i32
  }
}

</mosaic_0001>

<bundles_post_ra>
// kernel: tpu_custom_call.1
= control target key start
LH: loop header
LB: loop body
LE: loop exit
PB: predicated region body
PF: predicated region fallthrough
CT: control target
= control target key end

     0   :  { %8 = vsyncpa [#allocation3], 0  ;;  %s1083_s0 = inlined_call_operand.hbm [shape: f32[32,128], index: 0, kind: input, shape index: {}]   ;;  %s1084_s1 = inlined_call_operand.hbm [shape: f32[128,128], index: 1, kind: input, shape index: {}]   ;;  %s1085_s2 = inlined_call_operand.hbm [shape: f32[8,128], index: 2, kind: input, shape index: {}]   ;;  %s1086_s3 = inlined_call_operand.hbm [shape: f32[32,128], index: 3, kind: output, shape index: {}]  }
   0x1   :  { %10 = vsyncpa [#allocation3 + $0x1], 0 }
   0x2   :  { %11 = vsyncpa [#allocation6], 0 }
   0x3   :  { %12 = vsyncpa [#allocation4], 0 }
   0x4   :  { %14 = vsyncpa [#allocation4 + $0x1], 0  ;;  %s835_s12 = smov 0   ;;  %s837_s13 = smov 0  }
   0x5   :  { %s839_s14 = smov 0   ;;  %s841_s15 = smov 0  }
   0x6 LB: > { %s856_s16 = sadd.s32 4294967295, %s805_s15   ;;  %s466_s17 = sadd.s32 4294967294, %s805_s15   ;;  %s805_s15 = sphi %s841_s15, %s1106_s15   ;;  %s801_s14 = sphi %s839_s14, %s1105_s14   ;;  %s797_s13 = sphi %s837_s13, %s1104_s13   ;;  %s793_s12 = sphi %s835_s12, %s1103_s12  }
   0x7   : > { %p40_p0 = scmp.ne.s32.totalorder %s797_s13, %s793_s12  ;;  %p1087_p1 = scmp.eq.s32.totalorder %s856_s16, 0 }
   0x8   : > { %p112_p3 = scmp.eq.s32.totalorder %s466_s17, 1  ;;  %p467_p5 = scmp.ge.s32.totalorder %s805_s15, 1 }
   0x9   : > { %p865_p4 = por %p1087_p1, %p40_p0  ;;  %p119_p7 = scmp.lt.s32.totalorder %s805_s15, 3 }
   0xa   : > { %p870_p6 = por %p112_p3, %p40_p0  ;;  %s807_s21 = smov [#allocation5]  }
   0xb   : > { %s1090_s18 = scalar_select %p865_p4, 1, 0 }
   0xc   : > { %s1091_s19 = scalar_select %p870_p6, 1, 0 }
   0xd   : > { %p875_p8 = pnand %p467_p5, %p119_p7  ;;  %s131_s22 = sshll.u32 %s807_s21, 4  ;;  %s879_s22 = int_to_ptr.vmem [resolvable:$true] %s131_s22 }
   0xe   : > { %s808_s24 = smov [#allocation7]   ;;  %s649_s28 = scalar_lea.hbm %s1084_s1, 2048 }
   0xf   : > { %p586_p9 = pneg %p875_p8  ;;  %s145_s25 = sshll.u32 %s808_s24, 4  ;;  %s890_s25 = int_to_ptr.vmem [resolvable:$true] %s145_s25 }
  0x10   : > { %p650_p12 = scmp.ne.s32.totalorder %s1084_s1, %s649_s28  ;;  %p656_p5 = scmp.lt.u32.totalorder %s649_s28, %s1084_s1 }
  0x11   : > { %p886_p11 = pnand %p586_p9, %p1087_p1 }
  0x13   : > { %p651_p13 = pneg %p886_p11 }
  0x15   : > { %p652_p0 = pnand %p651_p13, %p650_p12 }
  0x17   : > { %p653_p3 = pneg %p652_p0 }
  0x19   : > { %p658_p7 = pnand %p656_p5, %p653_p3 }
  0x1b   : > { %661 = shalt.err (!%p658_p7)
}
  0x1c   : > { %s662_s6 = scalar_lea.vmem %s879_s22, 2048  ;;  %p670_p2 = scmp.lt.s32.totalorder %s879_s22, %s879_s22 }
  0x1d   : > { %p663_p9 = scmp.ne.s32.totalorder %s879_s22, %s662_s6  ;;  %p671_p12 = scmp.lt.s32.totalorder %s662_s6, %s662_s6 }
  0x1f   : > { %p665_p10 = pnand %p663_p9, %p651_p13  ;;  %p672_p0 = por %p671_p12, %p670_p2 }
  0x21   : > { %p666_p1 = pneg %p665_p10 }
  0x23   : > { %p673_p6 = pnand %p672_p0, %p666_p1 }
  0x25   : > { %676 = shalt.err (!%p673_p6)
}
  0x26   : > { %s809_s7 = smov 128   ;;  %s810_s8 = smov 8  }
  0x27   : > { %589 = dma.hbm_to_vmem [thread:$0]  (!%p886_p11), %s1084_s1, 2048, %s879_s22, [#allocation6], %s809_s7, %s809_s7, %s810_s8  }
  0x28   : > { %s677_s21 = scalar_lea.hbm %s1085_s2, 128 }
  0x29   : > { %p678_p1 = scmp.ne.s32.totalorder %s1085_s2, %s677_s21  ;;  %p684_p10 = scmp.lt.u32.totalorder %s677_s21, %s1085_s2 }
  0x2b   : > { %p680_p2 = pnand %p678_p1, %p651_p13 }
  0x2d   : > { %p681_p6 = pneg %p680_p2 }
  0x2f   : > { %p686_p3 = pnand %p684_p10, %p681_p6 }
  0x31   : > { %689 = shalt.err (!%p686_p3)
}
  0x32   : > { %s690_s22 = scalar_lea.vmem %s890_s25, 128  ;;  %p698_p12 = scmp.lt.s32.totalorder %s890_s25, %s890_s25 }
  0x33   : > { %p691_p5 = scmp.ne.s32.totalorder %s890_s25, %s690_s22  ;;  %p699_p0 = scmp.lt.s32.totalorder %s690_s22, %s690_s22 }
  0x35   : > { %p693_p7 = pnand %p691_p5, %p651_p13  ;;  %p700_p1 = por %p699_p0, %p698_p12 }
  0x37   : > { %p694_p9 = pneg %p693_p7 }
  0x39   : > { %p701_p2 = pnand %p700_p1, %p694_p9 }
  0x3b   : > { %704 = shalt.err (!%p701_p2)
}
  0x3c   : > { %592 = dma.hbm_to_vmem [thread:$0]  (!%p886_p11), %s1085_s2, 128, %s890_s25, [#allocation6]  }
  0x3d   : > { %s948_s4 = sadd.s32 1, %s805_s15   ;;  %s27_s23 = sadd.s32 1, %s801_s14 }
  0x3e   : > { %s24_s5 = ssub.s32 %s805_s15, %s948_s4  ;;  %p34_p13 = scmp.ne.s32.totalorder %s801_s14, %s797_s13 }
  0x3f   : > { %p25_p6 = scmp.eq.s32.totalorder %s24_s5, 0  ;;  %p35_p10 = scmp.eq.s32.totalorder %s805_s15, 0 }
  0x40   : > { %p1094_p3 = scmp.eq.s32.totalorder %s856_s16, 1  ;;  %p603_p7 = scmp.lt.s32.totalorder %s805_s15, 2 }
  0x41   : > { %s964_s9 = scalar_select %p25_p6, %s801_s14, %s27_s23  }
  0x42   : > { %p958_p5 = por %p1094_p3, %p34_p13  ;;  %p36_p9 = por %p35_p10, %p34_p13 }
  0x43   : > { %s156_s10 = sand.u32 1, %s801_s14   ;;  %s487_s25 = sshll.u32 %s805_s15, 8 }
  0x44   : > { %s1095_s6 = scalar_select %p958_p5, 1, 0 }
  0x45   : > { %s471_s11 = sshll.u32 %s156_s10, 4  ;;  %s971_s24 = scalar_lea.hbm %s1083_s0, %s487_s25 }
  0x46   : > { %s160_s26 = scalar_lea.vmem [#allocation2], %s471_s11  ;;  %p975_p11 = pnand %p603_p7, %p36_p9 }
  0x47   : > { %s167_s27 = sshll.u32 %s160_s26, 4  ;;  %s979_s22 = scalar_lea.sflag [#allocation3], %s156_s10  ;;  %s973_s27 = int_to_ptr.vmem [resolvable:$true] %s167_s27 }
  0x48   : > { %s705_s29 = scalar_lea.hbm %s971_s24, 256  ;;  %p707_p0 = pneg %p975_p11 }
  0x49   : > { %p706_p12 = scmp.ne.s32.totalorder %s971_s24, %s705_s29  ;;  %s710_s5 = scalar_lea.hbm %s1083_s0, 512 }
  0x4a   : > { %p711_p13 = scmp.lt.u32.totalorder %s971_s24, %s1083_s0  ;;  %p712_p6 = scmp.lt.u32.totalorder %s710_s5, %s705_s29 }
  0x4b   : > { %p708_p1 = pnand %p707_p0, %p706_p12  ;;  %p714_p3 = scmp.lt.u32.totalorder %s705_s29, %s971_s24 }
  0x4c   : > { %p713_p10 = por %p712_p6, %p711_p13 }
  0x4d   : > { %p709_p2 = pneg %p708_p1 }
  0x4e   : > { %p715_p7 = por %p714_p3, %p713_p10 }
  0x50   : > { %p716_p9 = pnand %p715_p7, %p709_p2 }
  0x52   : > { %719 = shalt.err (!%p716_p9)
}
  0x53   : > { %s720_s10 = scalar_lea.vmem %s973_s27, 256  ;;  %s811_s17 = smov [#allocation2]  }
  0x54   : > { %p721_p12 = scmp.ne.s32.totalorder %s973_s27, %s720_s10  ;;  %s725_s21 = sshll.u32 %s811_s17, 4  ;;  %s726_s21 = int_to_ptr.vmem [resolvable:$false] %s725_s21 }
  0x55   : > { %s727_s26 = scalar_lea.vmem %s726_s21, 512  ;;  %p728_p4 = scmp.lt.s32.totalorder %s973_s27, %s726_s21 }
  0x56   : > { %p723_p1 = pnand %p721_p12, %p707_p0  ;;  %p729_p13 = scmp.lt.s32.totalorder %s727_s26, %s720_s10 }
  0x58   : > { %p724_p5 = pneg %p723_p1  ;;  %p730_p6 = por %p729_p13, %p728_p4 }
  0x5a   : > { %p731_p10 = pnand %p730_p6, %p724_p5 }
  0x5c   : > { %734 = shalt.err (!%p731_p10)
}
  0x5d   : > { %596 = dma.hbm_to_vmem [thread:$0]  (!%p975_p11), %s971_s24, 256, %s973_s27, %s979_s22, %s809_s7, %s809_s7, %s810_s8  }
  0x5e   : > { %179 = sbr.rel (%p875_p8) target bundleno = 687 (0x2af), region = 32  ;;  %s1013_s29 = sand.u32 (!%p875_p8), 1, %s797_s13  }
  0x5f   : > { %s475_s30 = sshll.u32 (!%p875_p8), %s1013_s29, 4  ;;  %s182_s23 = scalar_lea.sflag (!%p875_p8), [#allocation3], %s1013_s29 }
  0x60   : > { %s1019_s28 = scalar_lea.vmem (!%p875_p8), [#allocation2], %s475_s30  ;;  %p1097_p4 = scmp.ne.s32.totalorder (!%p875_p8), %s1090_s18, 0 }
  0x65   : > { %780 = dma.done.wait (%p1097_p4), %s182_s23, 256  }
  0x66   : > { %782 = vsyncadd (%p1097_p4), %s182_s23, 4294967040  ;;  %p1098_p5 = scmp.eq.s32.totalorder %s856_s16, 0 }
  0x68   : > { %784 = dma.done.wait (%p1098_p5), [#allocation6], 2176   ;;  %p1099_p8 = pmov %p1098_p5 }
  0x69   : > { %v220_v0 = vld [vmem:[#allocation5] sm:$0xff]  ;;  %v221_v1 = vld [vmem:[#allocation5 + $0x8] sm:$0xff]  ;;  %v222_v2 = vld [vmem:[#allocation5 + $0x10] sm:$0xff]  ;;  %s488_s18 = sshll.u32 %s856_s16, 8  ;;  %s215_s20 = scalar_lea.vmem [#allocation8], %s475_s30 }
  0x6a   : > { %786 = vsyncadd (%p1099_p8), [#allocation6], 4294965120  ;;  %v542_v3 = vpack.c.bf16 %v221_v1, %v220_v0  ;;  %v223_v4 = vld [vmem:[#allocation5 + $0x18] sm:$0xff]  ;;  %v224_v6 = vld [vmem:[#allocation5 + $0x20] sm:$0xff]  ;;  %s374_s7 = sshll.u32 %s215_s20, 4  ;;  %s1037_s27 = scalar_lea.hbm %s1086_s3, %s488_s18  ;;  %s1039_s7 = int_to_ptr.vmem [resolvable:$true] %s374_s7 }
  0x6b   : > { %v546_v5 = vpack.c.bf16 %v223_v4, %v222_v2  ;;  %v225_v7 = vld [vmem:[#allocation5 + $0x28] sm:$0xff]  ;;  %v218_v9 = vld [vmem:[%s1019_s28] sm:$0xff]  ;;  %v227_v11 = vld [vmem:[#allocation5 + $0x38] sm:$0xff]  ;;  %s361_s22 = scalar_lea.sflag [#allocation4], %s1013_s29  ;;  %s735_s5 = scalar_lea.vmem %s1039_s7, 256 }
  0x6c   : > { %543 = vmatprep.subr.bf16.mxu0 %v542_v3  ;;  %v550_v8 = vpack.c.bf16 %v225_v7, %v224_v6  ;;  %v226_v10 = vld [vmem:[#allocation5 + $0x30] sm:$0xff]  ;;  %539 = vmatprep.mubr.f32.mxu0 %v218_v9  ;;  %v228_v13 = vld [vmem:[#allocation5 + $0x40] sm:$0xff]  ;;  %v229_v14 = vld [vmem:[#allocation5 + $0x48] sm:$0xff]  ;;  %p736_p11 = scmp.ne.s32.totalorder %s1039_s7, %s735_s5  ;;  %p1100_p0 = scmp.ne.s32.totalorder %s1095_s6, 0 }
  0x6d   : > { %545 = vmatpush3.bf16.msra.mxu0 %v542_v3  ;;  %v554_v12 = vpack.c.bf16 %v227_v11, %v226_v10  ;;  %v558_v15 = vpack.c.bf16 %v229_v14, %v228_v13  ;;  %v230_v16 = vld [vmem:[#allocation5 + $0x50] sm:$0xff]  ;;  %v231_v17 = vld [vmem:[#allocation5 + $0x58] sm:$0xff]  ;;  %v232_v19 = vld [vmem:[#allocation5 + $0x60] sm:$0xff]  ;;  %s812_s16 = smov [#allocation8]  }
  0x6e   : > { %547 = vmatprep.subr.bf16.mxu0 %v546_v5  ;;  %v562_v18 = vpack.c.bf16 %v231_v17, %v230_v16  ;;  %v233_v20 = vld [vmem:[#allocation5 + $0x68] sm:$0xff]  ;;  %v234_v22 = vld [vmem:[#allocation5 + $0x70] sm:$0xff]  ;;  %v235_v23 = vld [vmem:[#allocation5 + $0x78] sm:$0xff]  ;;  %p737_p2 = pnand %p736_p11, %p1100_p0  ;;  %s739_s11 = sshll.u32 %s812_s16, 4  ;;  %s740_s11 = int_to_ptr.vmem [resolvable:$false] %s739_s11 }
  0x6f   : > { %v566_v21 = vpack.c.bf16 %v233_v20, %v232_v19  ;;  %v570_v24 = vpack.c.bf16 %v235_v23, %v234_v22  ;;  %v219_v25 = vld [vmem:[%s1019_s28 + $0x8] sm:$0xff]  ;;  %v479_v26 = vld [vmem:[#allocation7] ss:$0 sm:$0xff]  ;;  %v480_v52 = vld [vmem:[#allocation7 + $0x1] ss:$0 sm:$0xff]  ;;  %s741_s25 = scalar_lea.vmem %s740_s11, 512  ;;  %p742_p7 = scmp.lt.s32.totalorder %s1039_s7, %s740_s11 }
  0x70   : > { %v481_v54 = vld [vmem:[#allocation7 + $0x2] ss:$0 sm:$0xff]  ;;  %p738_p3 = pneg %p737_p2  ;;  %p743_p9 = scmp.lt.s32.totalorder %s741_s25, %s735_s5 }
  0x71   : > { %549 = vmatpush3.bf16.msra.mxu0 %v546_v5 }
  0x72   : > { %551 = vmatprep.subr.bf16.mxu0 %v550_v8  ;;  %p744_p12 = por %p743_p9, %p742_p7 }
  0x74   : > { %p745_p1 = pnand %p744_p12, %p738_p3 }
  0x75   : > { %553 = vmatpush3.bf16.msra.mxu0 %v550_v8 }
  0x76   : > { %555 = vmatprep.subr.bf16.mxu0 %v554_v12 }
  0x79   : > { %557 = vmatpush3.bf16.msra.mxu0 %v554_v12 }
  0x7a   : > { %559 = vmatprep.subr.bf16.mxu0 %v558_v15 }
  0x7d   : > { %561 = vmatpush3.bf16.msra.mxu0 %v558_v15 }
  0x7e   : > { %563 = vmatprep.subr.bf16.mxu0 %v562_v18 }
  0x81   : > { %565 = vmatpush3.bf16.msra.mxu0 %v562_v18 }
  0x82   : > { %567 = vmatprep.subr.bf16.mxu0 %v566_v21 }
  0x85   : > { %569 = vmatpush3.bf16.msra.mxu0 %v566_v21 }
  0x86   : > { %571 = vmatprep.subr.bf16.mxu0 %v570_v24 }
  0x89   : > { %573 = vmatpush3.bf16.msra.mxu0 %v570_v24 }
  0x8c   : > { %540 = vmatmul.mubr.f32.vlgmr.msra.gmra.mrb[0].mxu0 %v219_v25 }
 0x15f   : > { %v541_v27 = vpop.f32.mrb[0].mxu0 }
 0x160   : > { %v309_v28 = vpop.f32.mrb[1].mxu0  ;;  %v315_v30 = vadd.f32 %v541_v27, %v479_v26 }
 0x161   : > { %v310_v29 = vadd.f32 %v479_v26, %v309_v28 }
 0x163   : > { %318 = vadd.xlane.f32.xlu0 %v310_v29 }
 0x167   : > { %320 = vadd.xlane.f32.xlu0 %v315_v30 }
 0x1f0   : > { %v319_v31 = vpop.xlane.xlu0 %318 }
 0x1f1   : > { %v322_v32 = vmul.f32 0.03125, %v319_v31 }
 0x1f3   : > { %v324_v33 = vsub.f32 %v310_v29, %v322_v32  ;;  %v332_v39 = vmul.f32 %v322_v32, %v322_v32 }
 0x1f4   : > { %v321_v34 = vpop.xlane.xlu0 %320 }
 0x1f5   : > { %v323_v35 = vmul.f32 0.03125, %v321_v34  ;;  %v326_v36 = vmul.f32 %v324_v33, %v324_v33  ;;  %v334_v41 = vmul.f32 96.0, %v332_v39 }
 0x1f7   : > { %v325_v37 = vsub.f32 %v315_v30, %v323_v35  ;;  %328 = vadd.xlane.f32.xlu1 %v326_v36  ;;  %v333_v40 = vmul.f32 %v323_v35, %v323_v35 }
 0x1f9   : > { %v327_v38 = vmul.f32 %v325_v37, %v325_v37  ;;  %v335_v44 = vmul.f32 96.0, %v333_v40 }
 0x1fb   : > { %330 = vadd.xlane.f32.xlu1 %v327_v38 }
 0x284   : > { %v329_v42 = vpop.xlane.xlu1 %328 }
 0x285   : > { %v336_v43 = vsub.f32 %v329_v42, %v334_v41 }
 0x287   : > { %v338_v45 = vmul.f32 0.03125, %v336_v43 }
 0x288   : > { %v331_v46 = vpop.xlane.xlu1 %330 }
 0x289   : > { %v340_v47 = vadd.f32 1e-05, %v338_v45  ;;  %v337_v48 = vsub.f32 %v331_v46, %v335_v44 }
 0x28b   : > { %645 = vrsqrt.f32 %v340_v47  ;;  %v339_v49 = vmul.f32 0.03125, %v337_v48 }
 0x28d   : > { %v341_v50 = vadd.f32 1e-05, %v339_v49 }
 0x28f   : > { %647 = vrsqrt.f32 %v341_v50 }
 0x295   : > { %v646_v51 = vpop.eup %645 }
 0x296   : > { %v344_v53 = vmul.f32 %v646_v51, %v324_v33 }
 0x298   : > { %v350_v55 = vmul.f32 %v480_v52, %v344_v53 }
 0x299   : > { %v648_v56 = vpop.eup %647 }
 0x29a   : > { %v356_v57 = vadd.f32 %v481_v54, %v350_v55  ;;  %v345_v58 = vmul.f32 %v648_v56, %v325_v37 }
 0x29c   : > { %v351_v59 = vmul.f32 %v480_v52, %v345_v58  ;;  %358 = vst [vmem:[%s215_s20] sm:$0xff] %v356_v57 }
 0x29e   : > { %v357_v60 = vadd.f32 %v481_v54, %v351_v59 }
 0x2a0   : > { %359 = vst [vmem:[%s215_s20 + $0x8] sm:$0xff] %v357_v60 }
 0x2a1   : > { %748 = shalt.err (!%p745_p1)
}
 0x2a2   : > { %s749_s10 = scalar_lea.hbm %s1037_s27, 256  ;;  %s753_s26 = scalar_lea.hbm %s1086_s3, 512 }
 0x2a3   : > { %p750_p13 = scmp.ne.s32.totalorder %s1037_s27, %s749_s10  ;;  %p754_p4 = scmp.lt.u32.totalorder %s1037_s27, %s1086_s3 }
 0x2a4   : > { %p755_p5 = scmp.lt.u32.totalorder %s753_s26, %s749_s10  ;;  %p757_p11 = scmp.lt.u32.totalorder %s749_s10, %s1037_s27 }
 0x2a5   : > { %p751_p6 = pnand %p750_p13, %p1100_p0 }
 0x2a6   : > { %p756_p8 = por %p755_p5, %p754_p4 }
 0x2a7   : > { %p752_p10 = pneg %p751_p6 }
 0x2a8   : > { %p758_p2 = por %p757_p11, %p756_p8 }
 0x2aa   : > { %p759_p3 = pnand %p758_p2, %p752_p10 }
 0x2ac   : > { %762 = shalt.err (!%p759_p3)
}
 0x2ad   : > { %s813_s28 = smov 128   ;;  %s814_s18 = smov 8  }
 0x2ae   : > { %584 = dma.vmem_to_hbm [thread:$0]  (%p1100_p0), %s1039_s7, 256, %s1037_s27, %s361_s22, %s813_s28, %s813_s28, %s814_s18  }
 0x2af PF: > { %s389_s20 = sand.u32 1, %s793_s12   ;;  %p1101_p7 = scmp.ne.s32.totalorder %s1091_s19, 0 }
 0x2b0   : > { %p1102_p9 = scmp.ge.s32.totalorder %s805_s15, 2  ;;  %s390_s8 = scalar_lea.sflag [#allocation4], %s389_s20 }
 0x2b2   : > { %p598_p12 = pnand %p1102_p9, %p1101_p7 }
 0x2b4   : > { %788 = dma.done.wait (!%p598_p12), %s390_s8, 256  }
 0x2b5   : > { %790 = vsyncadd (!%p598_p12), %s390_s8, 4294967040  ;;  %p17_p1 = scmp.ge.s32.totalorder %s948_s4, 4   ;;  %s1103_s12 = smov %s797_s13 }
 0x2b6   : > { %s1104_s13 = smov %s801_s14  ;;  %s1105_s14 = smov %s964_s9 }
 0x2b7   : > { %s1106_s15 = smov %s948_s4  ;;  %19 = sbr.rel (!%p17_p1) target bundleno = 6 (0x6), region = 85 }
 0x2be   :  { %395 = vsyncpa [#allocation3], 1 }
 0x2bf   :  { %397 = vsyncpa [#allocation3 + $0x1], 1 }
 0x2c0   :  { %398 = vsyncpa [#allocation6], 1 }
 0x2c1   :  { %399 = vsyncpa [#allocation4], 1 }
 0x2c2   :  { %401 = vsyncpa [#allocation4 + $0x1], 1 }

// kernel: tpu_custom_call.1
= control target key start
LH: loop header
LB: loop body
LE: loop exit
PB: predicated region body
PF: predicated region fallthrough
CT: control target
= control target key end

     0   :  { %8 = vsyncpa [#allocation3], 0  ;;  %s1083_s0 = inlined_call_operand.hbm [shape: f32[32,128], index: 0, kind: input, shape index: {}]   ;;  %s1084_s1 = inlined_call_operand.hbm [shape: f32[128,128], index: 1, kind: input, shape index: {}]   ;;  %s1085_s2 = inlined_call_operand.hbm [shape: f32[8,128], index: 2, kind: input, shape index: {}]   ;;  %s1086_s3 = inlined_call_operand.hbm [shape: f32[32,128], index: 3, kind: output, shape index: {}]  }
   0x1   :  { %10 = vsyncpa [#allocation3 + $0x1], 0 }
   0x2   :  { %11 = vsyncpa [#allocation6], 0 }
   0x3   :  { %12 = vsyncpa [#allocation4], 0 }
   0x4   :  { %14 = vsyncpa [#allocation4 + $0x1], 0  ;;  %s835_s12 = smov 0   ;;  %s837_s13 = smov 0  }
   0x5   :  { %s839_s14 = smov 0   ;;  %s841_s15 = smov 0  }
   0x6 LB: > { %s856_s16 = sadd.s32 4294967295, %s805_s15   ;;  %s466_s17 = sadd.s32 4294967294, %s805_s15   ;;  %s805_s15 = sphi %s841_s15, %s1106_s15   ;;  %s801_s14 = sphi %s839_s14, %s1105_s14   ;;  %s797_s13 = sphi %s837_s13, %s1104_s13   ;;  %s793_s12 = sphi %s835_s12, %s1103_s12  }
   0x7   : > { %p40_p0 = scmp.ne.s32.totalorder %s797_s13, %s793_s12  ;;  %p1087_p1 = scmp.eq.s32.totalorder %s856_s16, 0 }
   0x8   : > { %p112_p3 = scmp.eq.s32.totalorder %s466_s17, 1  ;;  %p467_p5 = scmp.ge.s32.totalorder %s805_s15, 1 }
   0x9   : > { %p865_p4 = por %p1087_p1, %p40_p0  ;;  %p119_p7 = scmp.lt.s32.totalorder %s805_s15, 3 }
   0xa   : > { %p870_p6 = por %p112_p3, %p40_p0  ;;  %s807_s21 = smov [#allocation5]  }
   0xb   : > { %s1090_s18 = scalar_select %p865_p4, 1, 0 }
   0xc   : > { %s1091_s19 = scalar_select %p870_p6, 1, 0 }
   0xd   : > { %p875_p8 = pnand %p467_p5, %p119_p7  ;;  %s131_s22 = sshll.u32 %s807_s21, 4  ;;  %s879_s22 = int_to_ptr.vmem [resolvable:$true] %s131_s22 }
   0xe   : > { %s808_s24 = smov [#allocation7]   ;;  %s649_s28 = scalar_lea.hbm %s1084_s1, 2048 }
   0xf   : > { %p586_p9 = pneg %p875_p8  ;;  %s145_s25 = sshll.u32 %s808_s24, 4  ;;  %s890_s25 = int_to_ptr.vmem [resolvable:$true] %s145_s25 }
  0x10   : > { %p650_p12 = scmp.ne.s32.totalorder %s1084_s1, %s649_s28  ;;  %p656_p5 = scmp.lt.u32.totalorder %s649_s28, %s1084_s1 }
  0x11   : > { %p886_p11 = pnand %p586_p9, %p1087_p1 }
  0x13   : > { %p651_p13 = pneg %p886_p11 }
  0x15   : > { %p652_p0 = pnand %p651_p13, %p650_p12 }
  0x17   : > { %p653_p3 = pneg %p652_p0 }
  0x19   : > { %p658_p7 = pnand %p656_p5, %p653_p3 }
  0x1b   : > { %661 = shalt.err (!%p658_p7)
}
  0x1c   : > { %s662_s6 = scalar_lea.vmem %s879_s22, 2048  ;;  %p670_p2 = scmp.lt.s32.totalorder %s879_s22, %s879_s22 }
  0x1d   : > { %p663_p9 = scmp.ne.s32.totalorder %s879_s22, %s662_s6  ;;  %p671_p12 = scmp.lt.s32.totalorder %s662_s6, %s662_s6 }
  0x1f   : > { %p665_p10 = pnand %p663_p9, %p651_p13  ;;  %p672_p0 = por %p671_p12, %p670_p2 }
  0x21   : > { %p666_p1 = pneg %p665_p10 }
  0x23   : > { %p673_p6 = pnand %p672_p0, %p666_p1 }
  0x25   : > { %676 = shalt.err (!%p673_p6)
}
  0x26   : > { %s809_s7 = smov 128   ;;  %s810_s8 = smov 8  }
  0x27   : > { %589 = dma.hbm_to_vmem [thread:$0]  (!%p886_p11), %s1084_s1, 2048, %s879_s22, [#allocation6], %s809_s7, %s809_s7, %s810_s8  }
  0x28   : > { %s677_s21 = scalar_lea.hbm %s1085_s2, 128 }
  0x29   : > { %p678_p1 = scmp.ne.s32.totalorder %s1085_s2, %s677_s21  ;;  %p684_p10 = scmp.lt.u32.totalorder %s677_s21, %s1085_s2 }
  0x2b   : > { %p680_p2 = pnand %p678_p1, %p651_p13 }
  0x2d   : > { %p681_p6 = pneg %p680_p2 }
  0x2f   : > { %p686_p3 = pnand %p684_p10, %p681_p6 }
  0x31   : > { %689 = shalt.err (!%p686_p3)
}
  0x32   : > { %s690_s22 = scalar_lea.vmem %s890_s25, 128  ;;  %p698_p12 = scmp.lt.s32.totalorder %s890_s25, %s890_s25 }
  0x33   : > { %p691_p5 = scmp.ne.s32.totalorder %s890_s25, %s690_s22  ;;  %p699_p0 = scmp.lt.s32.totalorder %s690_s22, %s690_s22 }
  0x35   : > { %p693_p7 = pnand %p691_p5, %p651_p13  ;;  %p700_p1 = por %p699_p0, %p698_p12 }
  0x37   : > { %p694_p9 = pneg %p693_p7 }
  0x39   : > { %p701_p2 = pnand %p700_p1, %p694_p9 }
  0x3b   : > { %704 = shalt.err (!%p701_p2)
}
  0x3c   : > { %592 = dma.hbm_to_vmem [thread:$0]  (!%p886_p11), %s1085_s2, 128, %s890_s25, [#allocation6]  }
  0x3d   : > { %s948_s4 = sadd.s32 1, %s805_s15   ;;  %s27_s23 = sadd.s32 1, %s801_s14 }
  0x3e   : > { %s24_s5 = ssub.s32 %s805_s15, %s948_s4  ;;  %p34_p13 = scmp.ne.s32.totalorder %s801_s14, %s797_s13 }
  0x3f   : > { %p25_p6 = scmp.eq.s32.totalorder %s24_s5, 0  ;;  %p35_p10 = scmp.eq.s32.totalorder %s805_s15, 0 }
  0x40   : > { %p1094_p3 = scmp.eq.s32.totalorder %s856_s16, 1  ;;  %p603_p7 = scmp.lt.s32.totalorder %s805_s15, 2 }
  0x41   : > { %s964_s9 = scalar_select %p25_p6, %s801_s14, %s27_s23  }
  0x42   : > { %p958_p5 = por %p1094_p3, %p34_p13  ;;  %p36_p9 = por %p35_p10, %p34_p13 }
  0x43   : > { %s156_s10 = sand.u32 1, %s801_s14   ;;  %s487_s25 = sshll.u32 %s805_s15, 8 }
  0x44   : > { %s1095_s6 = scalar_select %p958_p5, 1, 0 }
  0x45   : > { %s471_s11 = sshll.u32 %s156_s10, 4  ;;  %s971_s24 = scalar_lea.hbm %s1083_s0, %s487_s25 }
  0x46   : > { %s160_s26 = scalar_lea.vmem [#allocation2], %s471_s11  ;;  %p975_p11 = pnand %p603_p7, %p36_p9 }
  0x47   : > { %s167_s27 = sshll.u32 %s160_s26, 4  ;;  %s979_s22 = scalar_lea.sflag [#allocation3], %s156_s10  ;;  %s973_s27 = int_to_ptr.vmem [resolvable:$true] %s167_s27 }
  0x48   : > { %s705_s29 = scalar_lea.hbm %s971_s24, 256  ;;  %p707_p0 = pneg %p975_p11 }
  0x49   : > { %p706_p12 = scmp.ne.s32.totalorder %s971_s24, %s705_s29  ;;  %s710_s5 = scalar_lea.hbm %s1083_s0, 512 }
  0x4a   : > { %p711_p13 = scmp.lt.u32.totalorder %s971_s24, %s1083_s0  ;;  %p712_p6 = scmp.lt.u32.totalorder %s710_s5, %s705_s29 }
  0x4b   : > { %p708_p1 = pnand %p707_p0, %p706_p12  ;;  %p714_p3 = scmp.lt.u32.totalorder %s705_s29, %s971_s24 }
  0x4c   : > { %p713_p10 = por %p712_p6, %p711_p13 }
  0x4d   : > { %p709_p2 = pneg %p708_p1 }
  0x4e   : > { %p715_p7 = por %p714_p3, %p713_p10 }
  0x50   : > { %p716_p9 = pnand %p715_p7, %p709_p2 }
  0x52   : > { %719 = shalt.err (!%p716_p9)
}
  0x53   : > { %s720_s10 = scalar_lea.vmem %s973_s27, 256  ;;  %s811_s17 = smov [#allocation2]  }
  0x54   : > { %p721_p12 = scmp.ne.s32.totalorder %s973_s27, %s720_s10  ;;  %s725_s21 = sshll.u32 %s811_s17, 4  ;;  %s726_s21 = int_to_ptr.vmem [resolvable:$false] %s725_s21 }
  0x55   : > { %s727_s26 = scalar_lea.vmem %s726_s21, 512  ;;  %p728_p4 = scmp.lt.s32.totalorder %s973_s27, %s726_s21 }
  0x56   : > { %p723_p1 = pnand %p721_p12, %p707_p0  ;;  %p729_p13 = scmp.lt.s32.totalorder %s727_s26, %s720_s10 }
  0x58   : > { %p724_p5 = pneg %p723_p1  ;;  %p730_p6 = por %p729_p13, %p728_p4 }
  0x5a   : > { %p731_p10 = pnand %p730_p6, %p724_p5 }
  0x5c   : > { %734 = shalt.err (!%p731_p10)
}
  0x5d   : > { %596 = dma.hbm_to_vmem [thread:$0]  (!%p975_p11), %s971_s24, 256, %s973_s27, %s979_s22, %s809_s7, %s809_s7, %s810_s8  }
  0x5e   : > { %179 = sbr.rel (%p875_p8) target bundleno = 687 (0x2af), region = 32  ;;  %s1013_s29 = sand.u32 (!%p875_p8), 1, %s797_s13  }
  0x5f   : > { %s475_s30 = sshll.u32 (!%p875_p8), %s1013_s29, 4  ;;  %s182_s23 = scalar_lea.sflag (!%p875_p8), [#allocation3], %s1013_s29 }
  0x60   : > { %s1019_s28 = scalar_lea.vmem (!%p875_p8), [#allocation2], %s475_s30  ;;  %p1097_p4 = scmp.ne.s32.totalorder (!%p875_p8), %s1090_s18, 0 }
  0x65   : > { %780 = dma.done.wait (%p1097_p4), %s182_s23, 256  }
  0x66   : > { %782 = vsyncadd (%p1097_p4), %s182_s23, 4294967040  ;;  %p1098_p5 = scmp.eq.s32.totalorder %s856_s16, 0 }
  0x68   : > { %784 = dma.done.wait (%p1098_p5), [#allocation6], 2176   ;;  %p1099_p8 = pmov %p1098_p5 }
  0x69   : > { %v220_v0 = vld [vmem:[#allocation5] sm:$0xff]  ;;  %v221_v1 = vld [vmem:[#allocation5 + $0x8] sm:$0xff]  ;;  %v222_v2 = vld [vmem:[#allocation5 + $0x10] sm:$0xff]  ;;  %s488_s18 = sshll.u32 %s856_s16, 8  ;;  %s215_s20 = scalar_lea.vmem [#allocation8], %s475_s30 }
  0x6a   : > { %786 = vsyncadd (%p1099_p8), [#allocation6], 4294965120  ;;  %v542_v3 = vpack.c.bf16 %v221_v1, %v220_v0  ;;  %v223_v4 = vld [vmem:[#allocation5 + $0x18] sm:$0xff]  ;;  %v224_v6 = vld [vmem:[#allocation5 + $0x20] sm:$0xff]  ;;  %s374_s7 = sshll.u32 %s215_s20, 4  ;;  %s1037_s27 = scalar_lea.hbm %s1086_s3, %s488_s18  ;;  %s1039_s7 = int_to_ptr.vmem [resolvable:$true] %s374_s7 }
  0x6b   : > { %v546_v5 = vpack.c.bf16 %v223_v4, %v222_v2  ;;  %v225_v7 = vld [vmem:[#allocation5 + $0x28] sm:$0xff]  ;;  %v218_v9 = vld [vmem:[%s1019_s28] sm:$0xff]  ;;  %v227_v11 = vld [vmem:[#allocation5 + $0x38] sm:$0xff]  ;;  %s361_s22 = scalar_lea.sflag [#allocation4], %s1013_s29  ;;  %s735_s5 = scalar_lea.vmem %s1039_s7, 256 }
  0x6c   : > { %543 = vmatprep.subr.bf16.mxu0 %v542_v3  ;;  %v550_v8 = vpack.c.bf16 %v225_v7, %v224_v6  ;;  %v226_v10 = vld [vmem:[#allocation5 + $0x30] sm:$0xff]  ;;  %539 = vmatprep.mubr.f32.mxu0 %v218_v9  ;;  %v228_v13 = vld [vmem:[#allocation5 + $0x40] sm:$0xff]  ;;  %v229_v14 = vld [vmem:[#allocation5 + $0x48] sm:$0xff]  ;;  %p736_p11 = scmp.ne.s32.totalorder %s1039_s7, %s735_s5  ;;  %p1100_p0 = scmp.ne.s32.totalorder %s1095_s6, 0 }
  0x6d   : > { %545 = vmatpush3.bf16.msra.mxu0 %v542_v3  ;;  %v554_v12 = vpack.c.bf16 %v227_v11, %v226_v10  ;;  %v558_v15 = vpack.c.bf16 %v229_v14, %v228_v13  ;;  %v230_v16 = vld [vmem:[#allocation5 + $0x50] sm:$0xff]  ;;  %v231_v17 = vld [vmem:[#allocation5 + $0x58] sm:$0xff]  ;;  %v232_v19 = vld [vmem:[#allocation5 + $0x60] sm:$0xff]  ;;  %s812_s16 = smov [#allocation8]  }
  0x6e   : > { %547 = vmatprep.subr.bf16.mxu0 %v546_v5  ;;  %v562_v18 = vpack.c.bf16 %v231_v17, %v230_v16  ;;  %v233_v20 = vld [vmem:[#allocation5 + $0x68] sm:$0xff]  ;;  %v234_v22 = vld [vmem:[#allocation5 + $0x70] sm:$0xff]  ;;  %v235_v23 = vld [vmem:[#allocation5 + $0x78] sm:$0xff]  ;;  %p737_p2 = pnand %p736_p11, %p1100_p0  ;;  %s739_s11 = sshll.u32 %s812_s16, 4  ;;  %s740_s11 = int_to_ptr.vmem [resolvable:$false] %s739_s11 }
  0x6f   : > { %v566_v21 = vpack.c.bf16 %v233_v20, %v232_v19  ;;  %v570_v24 = vpack.c.bf16 %v235_v23, %v234_v22  ;;  %v219_v25 = vld [vmem:[%s1019_s28 + $0x8] sm:$0xff]  ;;  %v479_v26 = vld [vmem:[#allocation7] ss:$0 sm:$0xff]  ;;  %v480_v52 = vld [vmem:[#allocation7 + $0x1] ss:$0 sm:$0xff]  ;;  %s741_s25 = scalar_lea.vmem %s740_s11, 512  ;;  %p742_p7 = scmp.lt.s32.totalorder %s1039_s7, %s740_s11 }
  0x70   : > { %v481_v54 = vld [vmem:[#allocation7 + $0x2] ss:$0 sm:$0xff]  ;;  %p738_p3 = pneg %p737_p2  ;;  %p743_p9 = scmp.lt.s32.totalorder %s741_s25, %s735_s5 }
  0x71   : > { %549 = vmatpush3.bf16.msra.mxu0 %v546_v5 }
  0x72   : > { %551 = vmatprep.subr.bf16.mxu0 %v550_v8  ;;  %p744_p12 = por %p743_p9, %p742_p7 }
  0x74   : > { %p745_p1 = pnand %p744_p12, %p738_p3 }
  0x75   : > { %553 = vmatpush3.bf16.msra.mxu0 %v550_v8 }
  0x76   : > { %555 = vmatprep.subr.bf16.mxu0 %v554_v12 }
  0x79   : > { %557 = vmatpush3.bf16.msra.mxu0 %v554_v12 }
  0x7a   : > { %559 = vmatprep.subr.bf16.mxu0 %v558_v15 }
  0x7d   : > { %561 = vmatpush3.bf16.msra.mxu0 %v558_v15 }
  0x7e   : > { %563 = vmatprep.subr.bf16.mxu0 %v562_v18 }
  0x81   : > { %565 = vmatpush3.bf16.msra.mxu0 %v562_v18 }
  0x82   : > { %567 = vmatprep.subr.bf16.mxu0 %v566_v21 }
  0x85   : > { %569 = vmatpush3.bf16.msra.mxu0 %v566_v21 }
  0x86   : > { %571 = vmatprep.subr.bf16.mxu0 %v570_v24 }
  0x89   : > { %573 = vmatpush3.bf16.msra.mxu0 %v570_v24 }
  0x8c   : > { %540 = vmatmul.mubr.f32.vlgmr.msra.gmra.mrb[0].mxu0 %v219_v25 }
 0x15f   : > { %v541_v27 = vpop.f32.mrb[0].mxu0 }
 0x160   : > { %v309_v28 = vpop.f32.mrb[1].mxu0  ;;  %v315_v30 = vadd.f32 %v541_v27, %v479_v26 }
 0x161   : > { %v310_v29 = vadd.f32 %v479_v26, %v309_v28 }
 0x163   : > { %318 = vadd.xlane.f32.xlu0 %v310_v29 }
 0x167   : > { %320 = vadd.xlane.f32.xlu0 %v315_v30 }
 0x1f0   : > { %v319_v31 = vpop.xlane.xlu0 %318 }
 0x1f1   : > { %v322_v32 = vmul.f32 0.03125, %v319_v31 }
 0x1f3   : > { %v324_v33 = vsub.f32 %v310_v29, %v322_v32  ;;  %v332_v39 = vmul.f32 %v322_v32, %v322_v32 }
 0x1f4   : > { %v321_v34 = vpop.xlane.xlu0 %320 }
 0x1f5   : > { %v323_v35 = vmul.f32 0.03125, %v321_v34  ;;  %v326_v36 = vmul.f32 %v324_v33, %v324_v33  ;;  %v334_v41 = vmul.f32 96.0, %v332_v39 }
 0x1f7   : > { %v325_v37 = vsub.f32 %v315_v30, %v323_v35  ;;  %328 = vadd.xlane.f32.xlu1 %v326_v36  ;;  %v333_v40 = vmul.f32 %v323_v35, %v323_v35 }
 0x1f9   : > { %v327_v38 = vmul.f32 %v325_v37, %v325_v37  ;;  %v335_v44 = vmul.f32 96.0, %v333_v40 }
 0x1fb   : > { %330 = vadd.xlane.f32.xlu1 %v327_v38 }
 0x284   : > { %v329_v42 = vpop.xlane.xlu1 %328 }
 0x285   : > { %v336_v43 = vsub.f32 %v329_v42, %v334_v41 }
 0x287   : > { %v338_v45 = vmul.f32 0.03125, %v336_v43 }
 0x288   : > { %v331_v46 = vpop.xlane.xlu1 %330 }
 0x289   : > { %v340_v47 = vadd.f32 1e-05, %v338_v45  ;;  %v337_v48 = vsub.f32 %v331_v46, %v335_v44 }
 0x28b   : > { %645 = vrsqrt.f32 %v340_v47  ;;  %v339_v49 = vmul.f32 0.03125, %v337_v48 }
 0x28d   : > { %v341_v50 = vadd.f32 1e-05, %v339_v49 }
 0x28f   : > { %647 = vrsqrt.f32 %v341_v50 }
 0x295   : > { %v646_v51 = vpop.eup %645 }
 0x296   : > { %v344_v53 = vmul.f32 %v646_v51, %v324_v33 }
 0x298   : > { %v350_v55 = vmul.f32 %v480_v52, %v344_v53 }
 0x299   : > { %v648_v56 = vpop.eup %647 }
 0x29a   : > { %v356_v57 = vadd.f32 %v481_v54, %v350_v55  ;;  %v345_v58 = vmul.f32 %v648_v56, %v325_v37 }
 0x29c   : > { %v351_v59 = vmul.f32 %v480_v52, %v345_v58  ;;  %358 = vst [vmem:[%s215_s20] sm:$0xff] %v356_v57 }
 0x29e   : > { %v357_v60 = vadd.f32 %v481_v54, %v351_v59 }
 0x2a0   : > { %359 = vst [vmem:[%s215_s20 + $0x8] sm:$0xff] %v357_v60 }
 0x2a1   : > { %748 = shalt.err (!%p745_p1)
}
 0x2a2   : > { %s749_s10 = scalar_lea.hbm %s1037_s27, 256  ;;  %s753_s26 = scalar_lea.hbm %s1086_s3, 512 }
 0x2a3   : > { %p750_p13 = scmp.ne.s32.totalorder %s1037_s27, %s749_s10  ;;  %p754_p4 = scmp.lt.u32.totalorder %s1037_s27, %s1086_s3 }
 0x2a4   : > { %p755_p5 = scmp.lt.u32.totalorder %s753_s26, %s749_s10  ;;  %p757_p11 = scmp.lt.u32.totalorder %s749_s10, %s1037_s27 }
 0x2a5   : > { %p751_p6 = pnand %p750_p13, %p1100_p0 }
 0x2a6   : > { %p756_p8 = por %p755_p5, %p754_p4 }
 0x2a7   : > { %p752_p10 = pneg %p751_p6 }
 0x2a8   : > { %p758_p2 = por %p757_p11, %p756_p8 }
 0x2aa   : > { %p759_p3 = pnand %p758_p2, %p752_p10 }
 0x2ac   : > { %762 = shalt.err (!%p759_p3)
}
 0x2ad   : > { %s813_s28 = smov 128   ;;  %s814_s18 = smov 8  }
 0x2ae   : > { %584 = dma.vmem_to_hbm [thread:$0]  (%p1100_p0), %s1039_s7, 256, %s1037_s27, %s361_s22, %s813_s28, %s813_s28, %s814_s18  }
 0x2af PF: > { %s389_s20 = sand.u32 1, %s793_s12   ;;  %p1101_p7 = scmp.ne.s32.totalorder %s1091_s19, 0 }
 0x2b0   : > { %p1102_p9 = scmp.ge.s32.totalorder %s805_s15, 2  ;;  %s390_s8 = scalar_lea.sflag [#allocation4], %s389_s20 }
 0x2b2   : > { %p598_p12 = pnand %p1102_p9, %p1101_p7 }
 0x2b4   : > { %788 = dma.done.wait (!%p598_p12), %s390_s8, 256  }
 0x2b5   : > { %790 = vsyncadd (!%p598_p12), %s390_s8, 4294967040  ;;  %p17_p1 = scmp.ge.s32.totalorder %s948_s4, 4   ;;  %s1103_s12 = smov %s797_s13 }
 0x2b6   : > { %s1104_s13 = smov %s801_s14  ;;  %s1105_s14 = smov %s964_s9 }
 0x2b7   : > { %s1106_s15 = smov %s948_s4  ;;  %19 = sbr.rel (!%p17_p1) target bundleno = 6 (0x6), region = 85 }
 0x2be   :  { %395 = vsyncpa [#allocation3], 1 }
 0x2bf   :  { %397 = vsyncpa [#allocation3 + $0x1], 1 }
 0x2c0   :  { %398 = vsyncpa [#allocation6], 1 }
 0x2c1   :  { %399 = vsyncpa [#allocation4], 1 }
 0x2c2   :  { %401 = vsyncpa [#allocation4 + $0x1], 1 }

</bundles_post_ra>
